<compile_context>
chip_gen: v5e
topology: v5e:2x2
jax: 0.10.0
libtpu: 0.0.40
codegen_flags: <defaults>
</compile_context>

<pallas_src>
import functools

import jax
import jax.numpy as jnp
from jax.experimental import pallas as pl
from jax.experimental.pallas import tpu as pltpu


_NEG_BIG = -1e30            # finite "masked" bias; avoids exp(-inf - (-inf)) NaNs
_BIAS_DTYPE = jnp.bfloat16  # bf16 has f32's exponent range, so -1e30 is representable


# ---------------------------------------------------------------------------
# Kernel bodies
# ---------------------------------------------------------------------------
def _init_state(m_sc, l_sc, acc_sc):
    m_sc[...] = jnp.full(m_sc.shape, -jnp.inf, dtype=m_sc.dtype)
    l_sc[...] = jnp.zeros(l_sc.shape, dtype=l_sc.dtype)
    acc_sc[...] = jnp.zeros(acc_sc.shape, dtype=acc_sc.dtype)


def _finalize(o_ref, l_sc, acc_sc):
    inv_l = pl.reciprocal(l_sc[...], approx=True)  # EUP slot, ~free
    o_ref[...] = (acc_sc[...] * inv_l).astype(o_ref.dtype)


def _online_softmax_update(q_ref, k_ref, v_ref, b_ref, m_sc, l_sc, acc_sc, scale):
    """One online-softmax update for a (group, q-tile, kv-tile) visit.

    q_ref: (G, TQ, D)   k_ref/v_ref: (G, TK, D)   b_ref: (1|G, TQ, TK) or None
    scratch: m/l (G, TQ, 1) f32, acc (G, TQ, D) f32
    """
    q = q_ref[...]
    q = q * jnp.asarray(scale, dtype=q.dtype)  # fold scale into q (TQ*D, not TQ*TK muls)
    k = k_ref[...]
    v = v_ref[...]

    # scores: contract last axes of q and k (batched over G) -> (G, TQ, TK).
    s = jax.lax.dot_general(
        q, k,
        dimension_numbers=(((2,), (2,)), ((0,), (0,))),
        preferred_element_type=jnp.float32,
    )
    if b_ref is not None:
        # Additive mask bias (0 kept / -1e30 masked); broadcasts over the group
        # axis when the mask is shared across (B, H).
        s = s + b_ref[...].astype(jnp.float32)

    m_prev = m_sc[...]
    m_new = jnp.maximum(m_prev, jnp.max(s, axis=-1, keepdims=True))
    alpha = jnp.exp(m_prev - m_new)
    p = jnp.exp(s - m_new)
    l_sc[...] = alpha * l_sc[...] + jnp.sum(p, axis=-1, keepdims=True)
    acc_sc[...] = alpha * acc_sc[...] + jax.lax.dot_general(
        p.astype(v.dtype), v,
        dimension_numbers=(((2,), (1,)), ((0,), (0,))),
        preferred_element_type=jnp.float32,
    )
    m_sc[...] = m_new


def _kernel_nomask(q_ref, k_ref, v_ref, o_ref, m_sc, l_sc, acc_sc, *, scale):
    kv = pl.program_id(2)

    @pl.when(kv == 0)
    def _():
        _init_state(m_sc, l_sc, acc_sc)

    _online_softmax_update(q_ref, k_ref, v_ref, None, m_sc, l_sc, acc_sc, scale)

    @pl.when(kv == pl.num_programs(2) - 1)
    def _():
        _finalize(o_ref, l_sc, acc_sc)


def _kernel_bias(flags_ref, q_ref, k_ref, v_ref, b_ref, o_ref,
                 m_sc, l_sc, acc_sc, *, scale, nq, nk):
    g = pl.program_id(0)
    qi = pl.program_id(1)
    kv = pl.program_id(2)

    @pl.when(kv == 0)
    def _():
        _init_state(m_sc, l_sc, acc_sc)

    # Tile-level sparsity: scalar-prefetched SMEM flag says whether this
    # (group, q-tile, kv-tile) has ANY unmasked entry.  Fully-masked tiles
    # contribute exp(-inf)=0 everywhere, so skip all their compute.
    # (Their k/v/bias DMAs still happen — BlockSpec prefetch is unconditional.)
    flag = flags_ref[(g * nq + qi) * nk + kv]

    @pl.when(flag != 0)
    def _():
        _online_softmax_update(q_ref, k_ref, v_ref, b_ref, m_sc, l_sc, acc_sc, scale)

    @pl.when(kv == pl.num_programs(2) - 1)
    def _():
        _finalize(o_ref, l_sc, acc_sc)


# ---------------------------------------------------------------------------
# Tiling heuristics
# ---------------------------------------------------------------------------
def _pick_group(bh):
    """Heads per grid step: amortize per-step overhead, keep >=2 grid steps
    along the parallel axis so v7x's 2 TensorCores both get work."""
    for g in (8, 4, 2, 1):
        if bh % g == 0 and bh // g >= 2:
            return g
    return 1


def _pick_tile(s, cap, align):
    """Largest divisor of s that is <= cap and a multiple of `align`; else s."""
    if s <= cap:
        return s
    t = cap - (cap % align)
    while t >= align:
        if s % t == 0:
            return t
        t -= align
    return s


def _vmem_estimate(g, tq, tk, d, itemsize, bias_groups, have_bias):
    """Rough per-step VMEM footprint (double-buffered I/O + scratch)."""
    io = (2 * g * tq * d + 2 * g * tk * d) * itemsize           # q + o, k + v blocks
    if have_bias:
        io += bias_groups * tq * tk * jnp.dtype(_BIAS_DTYPE).itemsize
    scratch = g * tq * (d + 2) * 4                              # acc + m + l (f32)
    return 2 * io + scratch


# ---------------------------------------------------------------------------
# Wrapper (forward pass of SparseAttention)
# ---------------------------------------------------------------------------
def sparse_attention(query, key, value, mask=None, *, num_heads, head_dim, dropout=0.0):
    """query/key/value: (B, H, S, D).  Returns (B, H, S, D)."""
    B, H, S, D = query.shape
    assert H == num_heads and D == head_dim
    BH = B * H
    scale = float(head_dim) ** (-0.5)

    q = query.reshape(BH, S, D)
    k = key.reshape(BH, S, D)
    v = value.reshape(BH, S, D)

    TQ = _pick_tile(S, 512, 8)     # sublane-aligned q tile
    TK = _pick_tile(S, 512, 128)   # lane-aligned kv tile (or full S)
    nq, nk = S // TQ, S // TK

    itemsize = jnp.dtype(query.dtype).itemsize

    # Pre-classify the mask so VMEM sizing knows whether the bias is per-group.
    if mask is not None:
        mask_arr = jnp.asarray(mask)
        m_b = jnp.broadcast_to(mask_arr, jnp.broadcast_shapes(mask_arr.shape, (S, S)))
        keep = (m_b != 0)
        lead = keep.shape[:-2]
        shared = all(d == 1 for d in lead)
    else:
        keep, shared = None, True

    G = _pick_group(BH)
    budget = 36 * 1024 * 1024
    while G > 1 and _vmem_estimate(G, TQ, TK, D, itemsize,
                                   1 if shared else G, mask is not None) > budget:
        G //= 2  # G is a power of two dividing BH, so G//2 still divides BH

    n_g = BH // G
    grid = (n_g, nq, nk)

    scratch = [
        pltpu.VMEM((G, TQ, 1), jnp.float32),   # running max
        pltpu.VMEM((G, TQ, 1), jnp.float32),   # running sum
        pltpu.VMEM((G, TQ, D), jnp.float32),   # output accumulator
    ]
    out_shape = jax.ShapeDtypeStruct((BH, S, D), query.dtype)

    if mask is None:
        kernel = functools.partial(_kernel_nomask, scale=scale)
        in_specs = [
            pl.BlockSpec((G, TQ, D), lambda g, qi, ki: (g, qi, 0)),
            pl.BlockSpec((G, TK, D), lambda g, qi, ki: (g, ki, 0)),
            pl.BlockSpec((G, TK, D), lambda g, qi, ki: (g, ki, 0)),
        ]
        out_spec = pl.BlockSpec((G, TQ, D), lambda g, qi, ki: (g, qi, 0))
        num_prefetch = 0
        args = (q, k, v)
        bias_bytes = 0
    else:
        if shared:
            # Shared across (B, H): one (1, S, S) bias reused by every step.
            keep2 = keep.reshape(S, S)
            bias = jnp.where(keep2, 0.0, _NEG_BIG).astype(_BIAS_DTYPE)[None]      # (1,S,S)
            bias_spec = pl.BlockSpec((1, TQ, TK), lambda g, qi, ki, f: (0, qi, ki))
            tile_keep = keep2.reshape(nq, TQ, nk, TK).any(axis=(1, 3))            # (nq,nk)
            flags = jnp.broadcast_to(tile_keep[None], (n_g, nq, nk))
        else:
            keep_bh = jnp.broadcast_to(keep, (B, H, S, S)).reshape(BH, S, S)
            bias = jnp.where(keep_bh, 0.0, _NEG_BIG).astype(_BIAS_DTYPE)          # (BH,S,S)
            bias_spec = pl.BlockSpec((G, TQ, TK), lambda g, qi, ki, f: (g, qi, ki))
            flags = keep_bh.reshape(n_g, G, nq, TQ, nk, TK).any(axis=(1, 3, 5))   # (n_g,nq,nk)
        flags = flags.astype(jnp.int32).reshape(-1)  # 1D SMEM layout: [g, qi, ki]

        kernel = functools.partial(_kernel_bias, scale=scale, nq=nq, nk=nk)
        in_specs = [
            pl.BlockSpec((G, TQ, D), lambda g, qi, ki, f: (g, qi, 0)),
            pl.BlockSpec((G, TK, D), lambda g, qi, ki, f: (g, ki, 0)),
            pl.BlockSpec((G, TK, D), lambda g, qi, ki, f: (g, ki, 0)),
            bias_spec,
        ]
        out_spec = pl.BlockSpec((G, TQ, D), lambda g, qi, ki, f: (g, qi, 0))
        num_prefetch = 1
        args = (flags, q, k, v, bias)
        bias_bytes = int(bias.size) * jnp.dtype(_BIAS_DTYPE).itemsize

    cost = pl.CostEstimate(
        flops=4 * BH * S * S * D,
        transcendentals=BH * S * S,
        bytes_accessed=int(4 * BH * S * D * itemsize + bias_bytes),
    )

    out = pl.pallas_call(
        kernel,
        out_shape=out_shape,
        grid_spec=pltpu.PrefetchScalarGridSpec(
            num_scalar_prefetch=num_prefetch,
            grid=grid,
            in_specs=in_specs,
            out_specs=out_spec,
            scratch_shapes=scratch,
        ),
        compiler_params=pltpu.CompilerParams(
            dimension_semantics=("parallel", "parallel", "arbitrary"),
            vmem_limit_bytes=48 * 1024 * 1024,  # headroom under v7x's 64 MiB
        ),
        cost_estimate=cost,
    )(*args)

    # dropout=0.0 -> identity (inference semantics of nn.Dropout)
    return out.reshape(B, H, S, D)


# ---------------------------------------------------------------------------
# Reference + self-test
# ---------------------------------------------------------------------------
def _reference(query, key, value, mask, scale):
    s = jnp.einsum("bhqd,bhkd->bhqk", query, key).astype(jnp.float32) * scale
    if mask is not None:
        s = jnp.where(mask == 0, -jnp.inf, s)
    p = jax.nn.softmax(s, axis=-1)
    return jnp.einsum("bhqk,bhkd->bhqd", p, value.astype(jnp.float32)).astype(query.dtype)


if __name__ == "__main__":
    # Small shapes consistent with the module: batch=2, num_heads=4, seq=8, head_dim=32
    B, H, S, D = 2, 4, 8, 32
    num_heads, head_dim = H, D

    key0 = jax.random.PRNGKey(0)
    kq, kk, kv = jax.random.split(key0, 3)
    query = jax.random.normal(kq, (B, H, S, D), dtype=jnp.float32)
    key_t = jax.random.normal(kk, (B, H, S, D), dtype=jnp.float32)
    value = jax.random.normal(kv, (B, H, S, D), dtype=jnp.float32)

    scale = head_dim ** (-0.5)
    TOL = 1e-2  # accounts for the approximate (EUP) reciprocal in the finalize

    # 1) No-mask path
    out_nomask = sparse_attention(query, key_t, value, None,
                                  num_heads=num_heads, head_dim=head_dim)
    jax.block_until_ready(out_nomask)
    ref_nomask = _reference(query, key_t, value, None, scale)
    assert jnp.allclose(out_nomask, ref_nomask, atol=TOL, rtol=TOL)

    # 2) Mask shared over (B, H): single bias reused by every step + tile flags
    causal = jnp.tril(jnp.ones((S, S), dtype=jnp.int32))[None, None, :, :]  # (1,1,S,S)
    out_mask = sparse_attention(query, key_t, value, causal,
                                num_heads=num_heads, head_dim=head_dim)
    jax.block_until_ready(out_mask)
    ref_mask = _reference(query, key_t, value, causal, scale)
    assert jnp.allclose(out_mask, ref_mask, atol=TOL, rtol=TOL)

    # 3) Mask varying over batch (broadcast over heads): per-(B,H) bias path
    per_batch = jnp.tril(jnp.ones((S, S), dtype=jnp.int32))[None, None]       # (1,1,S,S)
    per_batch = jnp.concatenate(
        [per_batch, jnp.ones((1, 1, S, S), dtype=jnp.int32)], axis=0)          # (2,1,S,S)
    out_pb = sparse_attention(query, key_t, value, per_batch,
                              num_heads=num_heads, head_dim=head_dim)
    jax.block_until_ready(out_pb)
    ref_pb = _reference(query, key_t, value, per_batch, scale)
    assert jnp.allclose(out_pb, ref_pb, atol=TOL, rtol=TOL)

    print("KERNEL_OK")
</pallas_src>

<mosaic_0001>
module attributes {stable_mosaic.version = 11 : i64} {
  func.func @_kernel_nomask(%arg0: i32, %arg1: i32, %arg2: i32, %arg3: memref<4x8x32xf32, #tpu.memory_space<vmem>>, %arg4: memref<4x8x32xf32, #tpu.memory_space<vmem>>, %arg5: memref<4x8x32xf32, #tpu.memory_space<vmem>>, %arg6: memref<4x8x32xf32, #tpu.memory_space<vmem>>, %arg7: memref<4x8x1xf32, #tpu.memory_space<vmem>>, %arg8: memref<4x8x1xf32, #tpu.memory_space<vmem>>, %arg9: memref<4x8x32xf32, #tpu.memory_space<vmem>>) attributes {dimension_semantics = [#tpu.dimension_semantics<parallel>, #tpu.dimension_semantics<parallel>, #tpu.dimension_semantics<arbitrary>], iteration_bounds = array<i64: 2, 1, 1>, scalar_prefetch = 0 : i64, scratch_operands = 3 : i64, tpu.core_type = #tpu.core_type<tc>, window_params = [{transform_indices = @transform_0, window_bounds = array<i64: 4, 8, 32>}, {transform_indices = @transform_1, window_bounds = array<i64: 4, 8, 32>}, {transform_indices = @transform_2, window_bounds = array<i64: 4, 8, 32>}, {transform_indices = @transform_3, window_bounds = array<i64: 4, 8, 32>}]} {
    %c0_i32 = arith.constant 0 : i32
    %0 = arith.cmpi eq, %arg2, %c0_i32 : i32
    %1 = arith.extui %0 : i1 to i32
    %c0_i32_0 = arith.constant 0 : i32
    %2 = arith.cmpi ne, %1, %c0_i32_0 : i32
    scf.if %2 {
      %cst_33 = arith.constant 0xFF800000 : f32
      %34 = vector.broadcast %cst_33 : f32 to vector<4x8x1xf32>
      %c0_34 = arith.constant 0 : index
      %c0_35 = arith.constant 0 : index
      %c0_36 = arith.constant 0 : index
      %35 = vector.load %arg7[%c0_34, %c0_35, %c0_36] : memref<4x8x1xf32, #tpu.memory_space<vmem>>, vector<4x8x1xf32>
      tpu.vector_store %arg7[%c0_34, %c0_35, %c0_36], %34 {strides = array<i32>} : memref<4x8x1xf32, #tpu.memory_space<vmem>>, vector<4x8x1xf32>,
      %cst_37 = arith.constant 0.000000e+00 : f32
      %36 = vector.broadcast %cst_37 : f32 to vector<4x8x1xf32>
      %c0_38 = arith.constant 0 : index
      %c0_39 = arith.constant 0 : index
      %c0_40 = arith.constant 0 : index
      %37 = vector.load %arg8[%c0_38, %c0_39, %c0_40] : memref<4x8x1xf32, #tpu.memory_space<vmem>>, vector<4x8x1xf32>
      tpu.vector_store %arg8[%c0_38, %c0_39, %c0_40], %36 {strides = array<i32>} : memref<4x8x1xf32, #tpu.memory_space<vmem>>, vector<4x8x1xf32>,
      %cst_41 = arith.constant 0.000000e+00 : f32
      %38 = vector.broadcast %cst_41 : f32 to vector<4x8x32xf32>
      %c0_42 = arith.constant 0 : index
      %c0_43 = arith.constant 0 : index
      %c0_44 = arith.constant 0 : index
      %39 = vector.load %arg9[%c0_42, %c0_43, %c0_44] : memref<4x8x32xf32, #tpu.memory_space<vmem>>, vector<4x8x32xf32>
      tpu.vector_store %arg9[%c0_42, %c0_43, %c0_44], %38 {strides = array<i32>} : memref<4x8x32xf32, #tpu.memory_space<vmem>>, vector<4x8x32xf32>,
    } else {
    }
    %c0 = arith.constant 0 : index
    %c0_1 = arith.constant 0 : index
    %c0_2 = arith.constant 0 : index
    %3 = vector.load %arg3[%c0, %c0_1, %c0_2] : memref<4x8x32xf32, #tpu.memory_space<vmem>>, vector<4x8x32xf32>
    %cst = arith.constant 0.176776692 : f32
    %4 = vector.broadcast %cst : f32 to vector<4x8x32xf32>
    %5 = arith.mulf %3, %4 : vector<4x8x32xf32>
    %c0_3 = arith.constant 0 : index
    %c0_4 = arith.constant 0 : index
    %c0_5 = arith.constant 0 : index
    %6 = vector.load %arg4[%c0_3, %c0_4, %c0_5] : memref<4x8x32xf32, #tpu.memory_space<vmem>>, vector<4x8x32xf32>
    %c0_6 = arith.constant 0 : index
    %c0_7 = arith.constant 0 : index
    %c0_8 = arith.constant 0 : index
    %7 = vector.load %arg5[%c0_6, %c0_7, %c0_8] : memref<4x8x32xf32, #tpu.memory_space<vmem>>, vector<4x8x32xf32>
    %cst_9 = arith.constant dense<0.000000e+00> : vector<4x8x8xf32>
    %8 = tpu.matmul %5, %6, %cst_9 {dimension_numbers = #tpu.dot_dimension_numbers<[2], [2], [1], [1], [0, 0, 0, 1, 1, 1], [0], [0]>} : vector<4x8x32xf32>, vector<4x8x32xf32>, vector<4x8x8xf32> -> vector<4x8x8xf32>
    %c0_10 = arith.constant 0 : index
    %c0_11 = arith.constant 0 : index
    %c0_12 = arith.constant 0 : index
    %9 = vector.load %arg7[%c0_10, %c0_11, %c0_12] : memref<4x8x1xf32, #tpu.memory_space<vmem>>, vector<4x8x1xf32>
    %cst_13 = arith.constant dense<0xFF800000> : vector<4x8xf32>
    %10 = vector.multi_reduction <maximumf>, %8, %cst_13 [2] : vector<4x8x8xf32> to vector<4x8xf32>
    %11 = vector.shape_cast %10 : vector<4x8xf32> to vector<4x8x1xf32>
    %12 = arith.maximumf %9, %11 : vector<4x8x1xf32>
    %13 = arith.subf %9, %12 : vector<4x8x1xf32>
    %14 = math.exp %13 : vector<4x8x1xf32>
    %15 = vector.broadcast %12 : vector<4x8x1xf32> to vector<4x8x8xf32>
    %16 = arith.subf %8, %15 : vector<4x8x8xf32>
    %17 = math.exp %16 : vector<4x8x8xf32>
    %c0_14 = arith.constant 0 : index
    %c0_15 = arith.constant 0 : index
    %c0_16 = arith.constant 0 : index
    %18 = vector.load %arg8[%c0_14, %c0_15, %c0_16] : memref<4x8x1xf32, #tpu.memory_space<vmem>>, vector<4x8x1xf32>
    %19 = arith.mulf %14, %18 : vector<4x8x1xf32>
    %cst_17 = arith.constant dense<0.000000e+00> : vector<4x8xf32>
    %20 = vector.multi_reduction <add>, %17, %cst_17 [2] : vector<4x8x8xf32> to vector<4x8xf32>
    %21 = vector.shape_cast %20 : vector<4x8xf32> to vector<4x8x1xf32>
    %22 = arith.addf %19, %21 : vector<4x8x1xf32>
    %c0_18 = arith.constant 0 : index
    %c0_19 = arith.constant 0 : index
    %c0_20 = arith.constant 0 : index
    %23 = vector.load %arg8[%c0_18, %c0_19, %c0_20] : memref<4x8x1xf32, #tpu.memory_space<vmem>>, vector<4x8x1xf32>
    tpu.vector_store %arg8[%c0_18, %c0_19, %c0_20], %22 {strides = array<i32>} : memref<4x8x1xf32, #tpu.memory_space<vmem>>, vector<4x8x1xf32>,
    %c0_21 = arith.constant 0 : index
    %c0_22 = arith.constant 0 : index
    %c0_23 = arith.constant 0 : index
    %24 = vector.load %arg9[%c0_21, %c0_22, %c0_23] : memref<4x8x32xf32, #tpu.memory_space<vmem>>, vector<4x8x32xf32>
    %25 = vector.broadcast %14 : vector<4x8x1xf32> to vector<4x8x32xf32>
    %26 = arith.mulf %25, %24 : vector<4x8x32xf32>
    %cst_24 = arith.constant dense<0.000000e+00> : vector<4x8x32xf32>
    %27 = tpu.matmul %17, %7, %cst_24 {dimension_numbers = #tpu.dot_dimension_numbers<[2], [1], [1], [2], [0, 0, 0, 1, 1, 2], [0], [0]>} : vector<4x8x8xf32>, vector<4x8x32xf32>, vector<4x8x32xf32> -> vector<4x8x32xf32>
    %28 = arith.addf %26, %27 : vector<4x8x32xf32>
    %c0_25 = arith.constant 0 : index
    %c0_26 = arith.constant 0 : index
    %c0_27 = arith.constant 0 : index
    %29 = vector.load %arg9[%c0_25, %c0_26, %c0_27] : memref<4x8x32xf32, #tpu.memory_space<vmem>>, vector<4x8x32xf32>
    tpu.vector_store %arg9[%c0_25, %c0_26, %c0_27], %28 {strides = array<i32>} : memref<4x8x32xf32, #tpu.memory_space<vmem>>, vector<4x8x32xf32>,
    %c0_28 = arith.constant 0 : index
    %c0_29 = arith.constant 0 : index
    %c0_30 = arith.constant 0 : index
    %30 = vector.load %arg7[%c0_28, %c0_29, %c0_30] : memref<4x8x1xf32, #tpu.memory_space<vmem>>, vector<4x8x1xf32>
    tpu.vector_store %arg7[%c0_28, %c0_29, %c0_30], %12 {strides = array<i32>} : memref<4x8x1xf32, #tpu.memory_space<vmem>>, vector<4x8x1xf32>,
    %c0_i32_31 = arith.constant 0 : i32
    %31 = arith.cmpi eq, %arg2, %c0_i32_31 : i32
    %32 = arith.extui %31 : i1 to i32
    %c0_i32_32 = arith.constant 0 : i32
    %33 = arith.cmpi ne, %32, %c0_i32_32 : i32
    scf.if %33 {
      %c0_33 = arith.constant 0 : index
      %c0_34 = arith.constant 0 : index
      %c0_35 = arith.constant 0 : index
      %34 = vector.load %arg8[%c0_33, %c0_34, %c0_35] : memref<4x8x1xf32, #tpu.memory_space<vmem>>, vector<4x8x1xf32>
      %35 = tpu.reciprocal %34 {approx = true} : vector<4x8x1xf32> -> vector<4x8x1xf32>
      %c0_36 = arith.constant 0 : index
      %c0_37 = arith.constant 0 : index
      %c0_38 = arith.constant 0 : index
      %36 = vector.load %arg9[%c0_36, %c0_37, %c0_38] : memref<4x8x32xf32, #tpu.memory_space<vmem>>, vector<4x8x32xf32>
      %37 = vector.broadcast %35 : vector<4x8x1xf32> to vector<4x8x32xf32>
      %38 = arith.mulf %36, %37 : vector<4x8x32xf32>
      %c0_39 = arith.constant 0 : index
      %c0_40 = arith.constant 0 : index
      %c0_41 = arith.constant 0 : index
      %39 = vector.load %arg6[%c0_39, %c0_40, %c0_41] : memref<4x8x32xf32, #tpu.memory_space<vmem>>, vector<4x8x32xf32>
      tpu.vector_store %arg6[%c0_39, %c0_40, %c0_41], %38 {strides = array<i32>} : memref<4x8x32xf32, #tpu.memory_space<vmem>>, vector<4x8x32xf32>,
    } else {
    }
    return
  }
  func.func @transform_0(%arg0: i32, %arg1: i32, %arg2: i32) -> (i32, i32, i32) {
    %c0_i32 = arith.constant 0 : i32
    %c0_i32_0 = arith.constant 0 : i32
    return %arg0, %arg1, %c0_i32 : i32, i32, i32
  }
  func.func @transform_1(%arg0: i32, %arg1: i32, %arg2: i32) -> (i32, i32, i32) {
    %c0_i32 = arith.constant 0 : i32
    %c0_i32_0 = arith.constant 0 : i32
    return %arg0, %arg2, %c0_i32 : i32, i32, i32
  }
  func.func @transform_2(%arg0: i32, %arg1: i32, %arg2: i32) -> (i32, i32, i32) {
    %c0_i32 = arith.constant 0 : i32
    %c0_i32_0 = arith.constant 0 : i32
    return %arg0, %arg2, %c0_i32 : i32, i32, i32
  }
  func.func @transform_3(%arg0: i32, %arg1: i32, %arg2: i32) -> (i32, i32, i32) {
    %c0_i32 = arith.constant 0 : i32
    %c0_i32_0 = arith.constant 0 : i32
    return %arg0, %arg1, %c0_i32 : i32, i32, i32
  }
}

</mosaic_0001>

<bundles_post_ra>
// kernel: tpu_custom_call.1
= control target key start
LH: loop header
LB: loop body
LE: loop exit
PB: predicated region body
PF: predicated region fallthrough
CT: control target
= control target key end

     0   :  { %s1439_s0 = inlined_call_operand.hbm [shape: f32[8,8,32], index: 0, kind: input, shape index: {}]   ;;  %s1440_s1 = inlined_call_operand.hbm [shape: f32[8,8,32], index: 1, kind: input, shape index: {}]   ;;  %s1441_s2 = inlined_call_operand.hbm [shape: f32[8,8,32], index: 2, kind: input, shape index: {}]   ;;  %s1442_s3 = inlined_call_operand.hbm [shape: f32[8,8,32], index: 3, kind: output, shape index: {}]  }
   0x1   :  { %1448 = sst [smem:[#allocation20_spill]] %s1440_s1 }
   0x2   :  { %8 = vsyncpa [#allocation6], 0 }
   0x3   :  { %10 = vsyncpa [#allocation6 + $0x1], 0 }
   0x4   :  { %11 = vsyncpa [#allocation9], 0 }
   0x5   :  { %13 = vsyncpa [#allocation9 + $0x1], 0 }
   0x6   :  { %14 = vsyncpa [#allocation7], 0 }
   0x7   :  { %16 = vsyncpa [#allocation7 + $0x1], 0  ;;  %s1216_s12 = smov 0   ;;  %s1218_s13 = smov 0  }
   0x8   :  { %s1220_s14 = smov 0   ;;  %s1222_s15 = smov 0  }
   0x9   :  { %s1224_s16 = smov 0   ;;  %s1226_s17 = smov 0  }
   0xa LB: > { %1449 = sst [smem:[#allocation15_spill]] %s1175_s14  ;;  %s1247_s18 = sadd.s32 4294967295, %s1187_s17   ;;  %s1187_s17 = sphi %s1226_s17, %s22_s17   ;;  %s1183_s16 = sphi %s1224_s16, %s1465_s16   ;;  %s1179_s15 = sphi %s1222_s15, %s1464_s15   ;;  %s1175_s14 = sphi %s1220_s14, %s1468_s14   ;;  %s1171_s13 = sphi %s1218_s13, %s1467_s13   ;;  %s1167_s12 = sphi %s1216_s12, %s1466_s12  }
   0xb   : > { %1450 = sst [smem:[#allocation16_spill]] %s1183_s16  ;;  %s867_s19 = sadd.s32 4294967294, %s1187_s17  }
   0xc   : > { %1451 = sst [smem:[#allocation17_spill]] %s1187_s17  ;;  %s41_s20 = sadd.s32 1, %s1183_s16 }
   0xd   : > { %s50_s21 = sadd.s32 1, %s1175_s14  ;;  %p43_p0 = scmp.ge.s32.totalorder %s41_s20, 2 }
   0xe   : > { %p57_p1 = scmp.ne.s32.totalorder %s1175_s14, %s1171_s13  ;;  %p58_p2 = scmp.eq.s32.totalorder %s1187_s17, 0 }
   0xf   : > { %p63_p3 = scmp.ne.s32.totalorder %s1171_s13, %s1167_s12  ;;  %s1470_s20 = smov (%p43_p0, %s41_s20), 0 }
  0x10   : > { %1452 = sst [smem:[#allocation18_spill]] %s1470_s20  ;;  %p1259_p4 = por %p58_p2, %p57_p1 }
  0x11   : > { %p64_p5 = scmp.eq.s32.totalorder %s1247_s18, 0  ;;  %s45_s23 = ssub.s32 %s1183_s16, %s1470_s20 }
  0x12   : > { %p145_p6 = scmp.eq.s32.totalorder %s1247_s18, 1  ;;  %p48_p7 = scmp.eq.s32.totalorder %s45_s23, 0 }
  0x13   : > { %p1267_p8 = por %p64_p5, %p63_p3  ;;  %p151_p10 = scmp.eq.s32.totalorder %s867_s19, 1 }
  0x14   : > { %p1271_p9 = por %p145_p6, %p57_p1  ;;  %p869_p12 = scmp.ge.s32.totalorder %s1187_s17, 2 }
  0x15   : > { %s1276_s26 = scalar_select %p48_p7, %s1175_s14, %s50_s21  }
  0x16   : > { %p1278_p11 = por %p151_p10, %p63_p3  ;;  %p927_p13 = scmp.lt.s32.totalorder %s1187_s17, 2 }
  0x17   : > { %1456 = sst [smem:[#allocation19_spill]] %s1276_s26  ;;  %s171_s28 = sand.u32 1, %s1175_s14  }
  0x18   : > { %s1285_s29 = sshll.u32 %s171_s28, 5  ;;  %s901_s30 = sshll.u32 %s1183_s16, 5 }
  0x19   : > { %p1290_p0 = pnand %p927_p13, %p1259_p4  ;;  %s194_s5 = sand.u32 1, %s1187_s17  }
  0x1a   : > { %s1459_s1 = sld [smem:[#allocation20_spill]]  ;;  %s198_s10 = scalar_lea.vmem [#allocation8], %s1285_s29 }
  0x1b   : > { %s207_s11 = sshll.u32 %s198_s10, 4  ;;  %s195_s19 = scalar_lea.sflag [#allocation9], %s194_s5  ;;  %s208_s11 = int_to_ptr.vmem [resolvable:$true] %s207_s11 }
  0x1c   : > { %s1189_s21 = smov 128   ;;  %s1190_s22 = smov 8  }
  0x1d   : > { %p879_p1 = scmp.ge.s32.totalorder %s1187_s17, 1  ;;  %p238_p2 = scmp.lt.s32.totalorder %s1187_s17, 3 }
  0x1e   : > { %s172_s5 = scalar_lea.sflag [#allocation6], %s171_s28  ;;  %s227_s16 = scalar_lea.hbm %s1441_s2, %s901_s30 }
  0x1f   : > { %p1303_p3 = pnand %p879_p1, %p238_p2  ;;  %s228_s26 = sshll.u32 %s227_s16, 4  ;;  %s229_s26 = int_to_ptr.hbm [resolvable:$true] %s228_s26 }
  0x20   : > { %s204_s8 = scalar_lea.hbm %s1459_s1, %s901_s30  ;;  %s175_s1 = scalar_lea.vmem [#allocation5], %s1285_s29 }
  0x21   : > { %s205_s9 = sshll.u32 %s204_s8, 4  ;;  %s181_s8 = scalar_lea.hbm %s1439_s0, %s901_s30  ;;  %s206_s9 = int_to_ptr.hbm [resolvable:$true] %s205_s9 }
  0x22   : > { %919 = dma.hbm_to_vmem [thread:$0]  (!%p1290_p0), %s206_s9, 512, %s208_s11, %s195_s19, %s1189_s21, %s1189_s21, %s1190_s22  }
  0x23   : > { %s182_s10 = sshll.u32 %s181_s8, 4  ;;  %s184_s20 = sshll.u32 %s175_s1, 4  ;;  %s183_s10 = int_to_ptr.hbm [resolvable:$true] %s182_s10  ;;  %s185_s20 = int_to_ptr.vmem [resolvable:$true] %s184_s20 }
  0x24   : > { %916 = dma.hbm_to_vmem [thread:$0]  (!%p1290_p0), %s183_s10, 512, %s185_s20, %s172_s5, %s1189_s21, %s1189_s21, %s1190_s22  }
  0x25   : > { %s221_s14 = scalar_lea.vmem [#allocation10], %s1285_s29  ;;  %242 = sbr.rel (%p1303_p3) target bundleno = 725 (0x2d5), region = 32 }
  0x26   : > { %s230_s17 = sshll.u32 %s221_s14, 4  ;;  %s1322_s1 = sand.u32 (!%p1303_p3), 1, %s1171_s13   ;;  %s231_s17 = int_to_ptr.vmem [resolvable:$true] %s230_s17 }
  0x27   : > { %922 = dma.hbm_to_vmem [thread:$0]  (!%p1290_p0), %s229_s26, 512, %s231_s17, %s195_s19, %s1189_s21, %s1189_s21, %s1190_s22  }
  0x28   : > { %s1325_s20 = sshll.u32 (!%p1303_p3), %s1322_s1, 5  ;;  %s245_s28 = scalar_lea.sflag (!%p1303_p3), [#allocation6], %s1322_s1 }
  0x29   : > { %s248_s16 = scalar_lea.vmem (!%p1303_p3), [#allocation5], %s1325_s20 }
  0x2a   : > { %1154 = dma.done.wait (%p1267_p8), %s245_s28, 512  }
  0x2b   : > { %1156 = vsyncadd (%p1267_p8), %s245_s28, 4294966784  ;;  %s254_s14 = sand.u32 1, %s1247_s18   ;;  %s258_s26 = scalar_lea.vmem [#allocation8], %s1325_s20 }
  0x2c   : > { %s255_s17 = scalar_lea.sflag [#allocation9], %s254_s14 }
  0x2d   : > { %1158 = dma.done.wait (%p1267_p8), %s255_s17, 1024  }
  0x2e   : > { %1160 = vsyncadd (%p1267_p8), %s255_s17, 4294966272  ;;  %vm319_vm0 = vcmask 261120   ;;  %v332_v0 = vld [vmem:[%s258_s26] sm:$0xff]  ;;  %v334_v1 = vld [vmem:[%s258_s26 + $0x10] sm:$0xff]  ;;  %vm310_vm1 = vcmask 7168   ;;  %v1191_v12 = vmov -inf  }
  0x2f   : > { %v324_v2 = vld [vmem:[%s248_s16] sm:$0xff]  ;;  %884 = vmatpush.xpose.msk.msra.mxu0 %vm319_vm0, %v332_v0  ;;  %888 = vmatpush.xpose.msk.msra.mxu2 %vm319_vm0, %v334_v1  ;;  %v326_v4 = vld [vmem:[%s248_s16 + $0x10] sm:$0xff]  ;;  %v333_v5 = vld [vmem:[%s258_s26 + $0x8] sm:$0xff]  ;;  %311 = vst.msk [vmem:[#allocation2] sm:$0xff] %vm310_vm1, %v1191_v12  ;;  %vm449_vm2 = vcmask 64512   ;;  %v1192_v21 = vmov 0  }
  0x30   : > { %v328_v3 = vmul.f32 0.17677669, %v324_v2  ;;  %v335_v6 = vld [vmem:[%s258_s26 + $0x18] sm:$0xff]  ;;  %v330_v7 = vmul.f32 0.17677669, %v326_v4  ;;  %886 = vmatpush.xpose.msk.msra.mxu1 %vm319_vm0, %v333_v5  ;;  %v325_v8 = vld [vmem:[%s248_s16 + $0x8] sm:$0xff]  ;;  %984 = vset.pattern.permute.xlu0 %v1192_v21 }
  0x31   : > { %890 = vmatpush.xpose.msk.msra.mxu3 %vm319_vm0, %v335_v6  ;;  %v327_v9 = vld [vmem:[%s248_s16 + $0x18] sm:$0xff]  ;;  %v329_v10 = vmul.f32 0.17677669, %v325_v8  ;;  %312 = vst.msk [vmem:[#allocation2 + $0x8] sm:$0xff] %vm310_vm1, %v1191_v12  ;;  %986 = vset.pattern.permute.xlu2 %v1192_v21  ;;  %v1193_v22 = vmov 0.0   ;;  %s268_s18 = scalar_lea.vmem [#allocation10], %s1325_s20 }
  0x32   : > { %v331_v11 = vmul.f32 0.17677669, %v327_v9  ;;  %885 = vmatmul.msk.f32.vlgmr.msra.gmra.mxu0 %vm319_vm0, %v328_v3  ;;  %889 = vmatmul.msk.f32.vlgmr.msra.gmra.mxu2 %vm319_vm0, %v330_v7  ;;  %313 = vst.msk [vmem:[#allocation2 + $0x10] sm:$0xff] %vm310_vm1, %v1191_v12  ;;  %v338_v39 = vld [vmem:[%s268_s18 + $0x10] sm:$0xff]  ;;  %v339_v40 = vld [vmem:[%s268_s18 + $0x18] sm:$0xff]  ;;  %v336_v41 = vld [vmem:[%s268_s18] sm:$0xff] }
  0x33   : > { %887 = vmatmul.msk.f32.vlgmr.msra.gmra.mxu1 %vm319_vm0, %v329_v10  ;;  %314 = vst.msk [vmem:[#allocation2 + $0x18] sm:$0xff] %vm310_vm1, %v1191_v12  ;;  %985 = vset.pattern.permute.xlu1 %v1192_v21  ;;  %v337_v42 = vld [vmem:[%s268_s18 + $0x8] sm:$0xff]  ;;  %s301_s24 = scalar_lea.vmem [#allocation11], %s1325_s20  ;;  %s904_s29 = sshll.u32 %s1179_s15, 5 }
  0x34   : > { %891 = vmatmul.msk.f32.vlgmr.msra.gmra.mxu3 %vm319_vm0, %v331_v11  ;;  %317 = vst.msk [vmem:[#allocation3 + $0x10] sm:$0xff] %vm310_vm1, %v1193_v22  ;;  %631 = vmatpush.msrb.mxu2 %v338_v39  ;;  %s727_s19 = scalar_lea.hbm %s1442_s3, %s904_s29  ;;  %s728_s21 = sshll.u32 %s301_s24, 4  ;;  %s729_s21 = int_to_ptr.vmem [resolvable:$true] %s728_s21 }
  0x35   : > { %315 = vst.msk [vmem:[#allocation3] sm:$0xff] %vm310_vm1, %v1193_v22  ;;  %654 = vmatpush.msrb.mxu3 %v339_v40  ;;  %585 = vmatpush.msrb.mxu0 %v336_v41  ;;  %s730_s22 = sshll.u32 %s727_s19, 4  ;;  %s715_s23 = scalar_lea.sflag [#allocation7], %s1322_s1  ;;  %s731_s22 = int_to_ptr.hbm [resolvable:$true] %s730_s22 }
  0x36   : > { %316 = vst.msk [vmem:[#allocation3 + $0x8] sm:$0xff] %vm310_vm1, %v1193_v22  ;;  %v1369_v23 = vld [vmem:[#allocation2] sm:$0xff]  ;;  %608 = vmatpush.msrb.mxu1 %v337_v42  ;;  %s1115_s6 = sshra.s32 %s731_s22, 4  ;;  %s1121_s10 = scalar_lea.hbm %s1442_s3, 64  ;;  %s1116_s6 = int_to_ptr.hbm [resolvable:$true] %s1115_s6 }
  0x37   : > { %318 = vst.msk [vmem:[#allocation3 + $0x18] sm:$0xff] %vm310_vm1, %v1193_v22  ;;  %s1117_s7 = scalar_lea.hbm %s1116_s6, 32  ;;  %p1122_p7 = scmp.lt.s32.totalorder %s1116_s6, %s1442_s3 }
  0x38   : > { %320 = vst.msk [vmem:[#allocation4] sm:$0xff] %vm319_vm0, %v1193_v22  ;;  %v446_v29 = vld [vmem:[#allocation2 + $0x8] sm:$0xff]  ;;  %p1118_p4 = scmp.ne.s32.totalorder %s1116_s6, %s1117_s7  ;;  %p1123_p8 = scmp.lt.s32.totalorder %s1121_s10, %s1117_s7 }
  0x39   : > { %321 = vst.msk [vmem:[#allocation4 + $0x8] sm:$0xff] %vm319_vm0, %v1193_v22  ;;  %v447_v27 = vld [vmem:[#allocation2 + $0x10] sm:$0xff] }
  0x3a   : > { %322 = vst.msk [vmem:[#allocation4 + $0x10] sm:$0xff] %vm319_vm0, %v1193_v22  ;;  %v448_v35 = vld [vmem:[#allocation2 + $0x18] sm:$0xff]  ;;  %p1119_p5 = pnand %p1118_p4, %p1271_p9  ;;  %p1124_p10 = por %p1123_p8, %p1122_p7 }
  0x3b   : > { %323 = vst.msk [vmem:[#allocation4 + $0x18] sm:$0xff] %vm319_vm0, %v1193_v22  ;;  %v512_v6 = vld [vmem:[#allocation3 + $0x10] sm:$0xff] }
  0x3c   : > { %v510_v12 = vld [vmem:[#allocation3] sm:$0xff]  ;;  %p1120_p6 = pneg %p1119_p5 }
  0x3e   : > { %v513_v40 = vld [vmem:[#allocation3 + $0x18] sm:$0xff]  ;;  %p1125_p13 = pnand %p1124_p10, %p1120_p6 }
  0xaf   : > { %v1351_v13 = vpop.f32.mrf.mxu0 }
  0xb0   : > { %v450_v14 = vsel %vm449_vm2, %v1351_v13, -inf  ;;  %v1355_v15 = vpop.f32.mrf.mxu1 }
  0xb1   : > { %451 = vmax.xlane.f32.xlu1 %v450_v14  ;;  %v453_v18 = vsel %vm449_vm2, %v1355_v15, -inf }
  0xb5   : > { %v416_v16 = vpop.f32.mrf.mxu2 }
  0xb6   : > { %v456_v17 = vsel %vm449_vm2, %v416_v16, -inf }
  0xb7   : > { %457 = vmax.xlane.f32.xlu0 %v456_v17  ;;  %v442_v19 = vpop.f32.mrf.mxu3  ;;  %v511_v17 = vld [vmem:[#allocation3 + $0x8] sm:$0xff] }
  0xb8   : > { %v459_v20 = vsel %vm449_vm2, %v442_v19, -inf }
  0xb9   : > { %454 = vmax.xlane.f32.xlu1 %v453_v18  ;;  %v539_v18 = vld [vmem:[#allocation4] sm:$0xff] }
  0xbf   : > { %460 = vmax.xlane.f32.xlu0 %v459_v20 }
 0x124   : > { %v452_v24 = vpop.xlane.xlu1 %451 }
 0x125   : > { %v462_v25 = vmax.f32 %v1369_v23, %v452_v24 }
 0x127   : > { %v466_v26 = vsub.f32 %v1369_v23, %v462_v25  ;;  %667 = vst.msk [vmem:[#allocation2] sm:$0xff] %vm310_vm1, %v462_v25  ;;  %480 = vperm.xlu0 %984, %v462_v25  }
 0x129   : > { %v470_v62 = vmul.f32 1.442695, %v466_v26 }
 0x12a   : > { %v458_v28 = vpop.xlane.xlu0 %457 }
 0x12b   : > { %v464_v30 = vmax.f32 %v447_v27, %v458_v28 }
 0x12c   : > { %v455_v31 = vpop.xlane.xlu1 %454 }
 0x12d   : > { %v468_v32 = vsub.f32 %v447_v27, %v464_v30  ;;  %669 = vst.msk [vmem:[#allocation2 + $0x10] sm:$0xff] %vm310_vm1, %v464_v30  ;;  %v463_v33 = vmax.f32 %v446_v29, %v455_v31  ;;  %490 = vperm.xlu2 %986, %v464_v30   ;;  %v541_v27 = vld [vmem:[#allocation4 + $0x10] sm:$0xff] }
 0x12f   : > { %v467_v34 = vsub.f32 %v446_v29, %v463_v33  ;;  %668 = vst.msk [vmem:[#allocation2 + $0x8] sm:$0xff] %vm310_vm1, %v463_v33  ;;  %485 = vperm.xlu1 %985, %v463_v33   ;;  %v474_v63 = vmul.f32 1.442695, %v468_v32 }
 0x131   : > { %v472_v0 = vmul.f32 1.442695, %v467_v34 }
 0x132   : > { %v461_v36 = vpop.xlane.xlu0 %460 }
 0x133   : > { %v465_v37 = vmax.f32 %v448_v35, %v461_v36 }
 0x135   : > { %v469_v38 = vsub.f32 %v448_v35, %v465_v37  ;;  %670 = vst.msk [vmem:[#allocation2 + $0x18] sm:$0xff] %vm310_vm1, %v465_v37  ;;  %495 = vperm.xlu2 %986, %v465_v37   ;;  %v540_v35 = vld [vmem:[#allocation4 + $0x8] sm:$0xff] }
 0x137   : > { %v476_v5 = vmul.f32 1.442695, %v469_v38 }
 0x187   : > { %v491_v43 = vpop.permute.xlu2 %490 }
 0x188   : > { %v500_v44 = vsub.f32 %v416_v16, %v491_v43 }
 0x18a   : > { %v506_v45 = vmul.f32 1.442695, %v500_v44  ;;  %v542_v44 = vld [vmem:[#allocation4 + $0x18] sm:$0xff] }
 0x18c   : > { %987 = vpow2.f32 %v506_v45 }
 0x18f   : > { %v496_v46 = vpop.permute.xlu2 %495 }
 0x190   : > { %v501_v47 = vsub.f32 %v442_v19, %v496_v46 }
 0x192   : > { %v988_v48 = vpop.eup %987  ;;  %v508_v49 = vmul.f32 1.442695, %v501_v47 }
 0x193   : > { %894 = vmatmul.msk.f32.vlgmr.msrb.gmra.mxu2 %vm449_vm2, %v988_v48  ;;  %v524_v50 = vsel %vm449_vm2, %v988_v48, 0.0 }
 0x194   : > { %989 = vpow2.f32 %v508_v49  ;;  %525 = vadd.xlane.f32.xlu0 %v524_v50 }
 0x199   : > { %v481_v51 = vpop.permute.xlu0 %480 }
 0x19a   : > { %v990_v52 = vpop.eup %989  ;;  %v498_v53 = vsub.f32 %v1351_v13, %v481_v51 }
 0x19b   : > { %895 = vmatmul.msk.f32.vlgmr.msrb.gmra.mxu3 %vm449_vm2, %v990_v52  ;;  %v527_v4 = vsel %vm449_vm2, %v990_v52, 0.0 }
 0x19c   : > { %v502_v54 = vmul.f32 1.442695, %v498_v53 }
 0x19e   : > { %991 = vpow2.f32 %v502_v54 }
 0x1a1   : > { %v486_v55 = vpop.permute.xlu1 %485 }
 0x1a2   : > { %v499_v56 = vsub.f32 %v1355_v15, %v486_v55 }
 0x1a4   : > { %v992_v57 = vpop.eup %991  ;;  %v504_v58 = vmul.f32 1.442695, %v499_v56 }
 0x1a5   : > { %892 = vmatmul.msk.f32.vlgmr.msrb.gmra.mxu0 %vm449_vm2, %v992_v57  ;;  %v518_v59 = vsel %vm449_vm2, %v992_v57, 0.0 }
 0x1a6   : > { %993 = vpow2.f32 %v504_v58  ;;  %519 = vadd.xlane.f32.xlu2 %v518_v59 }
 0x1a7   : > { %995 = vpow2.f32 %v470_v62 }
 0x1a8   : > { %997 = vpow2.f32 %v474_v63 }
 0x1a9   : > { %999 = vpow2.f32 %v472_v0 }
 0x1aa   : > { %1001 = vpow2.f32 %v476_v5 }
 0x1ac   : > { %v994_v60 = vpop.eup %993 }
 0x1ad   : > { %893 = vmatmul.msk.f32.vlgmr.msrb.gmra.mxu1 %vm449_vm2, %v994_v60  ;;  %v521_v61 = vsel %vm449_vm2, %v994_v60, 0.0  ;;  %v996_v1 = vpop.eup %995 }
 0x1ae   : > { %522 = vadd.xlane.f32.xlu1 %v521_v61  ;;  %v998_v2 = vpop.eup %997  ;;  %v514_v14 = vmul.f32 %v996_v1, %v510_v12 }
 0x1af   : > { %v1000_v3 = vpop.eup %999  ;;  %v516_v8 = vmul.f32 %v998_v2, %v512_v6 }
 0x1b0   : > { %v1002_v7 = vpop.eup %1001  ;;  %v515_v19 = vmul.f32 %v1000_v3, %v511_v17 }
 0x1b1   : > { %v517_v41 = vmul.f32 %v1002_v7, %v513_v40 }
 0x1be   : > { %545 = vperm.xlu2 %986, %v996_v1  }
 0x1c6   : > { %555 = vperm.xlu2 %986, %v998_v2  }
 0x1c7   : > { %550 = vperm.xlu1 %985, %v1000_v3  }
 0x1ef   : > { %528 = vadd.xlane.f32.xlu2 %v527_v4 }
 0x207   : > { %v526_v9 = vpop.xlane.xlu0 %525  ;;  %560 = vperm.xlu2 %986, %v1002_v7  }
 0x208   : > { %v532_v10 = vadd.f32 %v526_v9, %v516_v8 }
 0x20a   : > { %537 = vst.msk [vmem:[#allocation3 + $0x10] sm:$0xff] %vm310_vm1, %v532_v10 }
 0x211   : > { %v676_v11 = vld [vmem:[#allocation3 + $0x10] sm:$0xff] }
 0x212   : > { %1003 = vrcp.f32 %v676_v11 }
 0x216   : > { %v633_v31 = vpop.f32.mrf.mxu2 }
 0x218   : > { %v1004_v13 = vpop.eup %1003 }
 0x219   : > { %v520_v15 = vpop.xlane.xlu2 %519  ;;  %698 = vperm.xlu1 %985, %v1004_v13  }
 0x21a   : > { %v530_v16 = vadd.f32 %v520_v15, %v514_v14 }
 0x21c   : > { %535 = vst.msk [vmem:[#allocation3] sm:$0xff] %vm310_vm1, %v530_v16 }
 0x21e   : > { %v656_v47 = vpop.f32.mrf.mxu3 }
 0x221   : > { %v523_v20 = vpop.xlane.xlu1 %522  ;;  %v546_v21 = vpop.permute.xlu2 %545 }
 0x222   : > { %v531_v22 = vadd.f32 %v523_v20, %v515_v19  ;;  %v563_v23 = vmul.f32 %v546_v21, %v539_v18  ;;  %v587_v24 = vpop.f32.mrf.mxu0 }
 0x223   : > { %v674_v25 = vld [vmem:[#allocation3] sm:$0xff] }
 0x224   : > { %536 = vst.msk [vmem:[#allocation3 + $0x8] sm:$0xff] %vm310_vm1, %v531_v22  ;;  %v659_v26 = vadd.f32 %v587_v24, %v563_v23  ;;  %1005 = vrcp.f32 %v674_v25 }
 0x226   : > { %663 = vst.msk [vmem:[#allocation4] sm:$0xff] %vm319_vm0, %v659_v26 }
 0x229   : > { %v556_v28 = vpop.permute.xlu2 %555 }
 0x22a   : > { %v1006_v29 = vpop.eup %1005  ;;  %v565_v30 = vmul.f32 %v556_v28, %v541_v27  ;;  %v610_v38 = vpop.f32.mrf.mxu1 }
 0x22b   : > { %688 = vperm.xlu0 %984, %v1006_v29   ;;  %v675_v32 = vld [vmem:[#allocation3 + $0x8] sm:$0xff] }
 0x22c   : > { %v661_v33 = vadd.f32 %v633_v31, %v565_v30  ;;  %1007 = vrcp.f32 %v675_v32 }
 0x22d   : > { %v682_v57 = vld [vmem:[#allocation4] sm:$0xff] }
 0x22e   : > { %665 = vst.msk [vmem:[#allocation4 + $0x10] sm:$0xff] %vm319_vm0, %v661_v33 }
 0x232   : > { %v1008_v34 = vpop.eup %1007 }
 0x233   : > { %693 = vperm.xlu2 %986, %v1008_v34  }
 0x235   : > { %v684_v52 = vld [vmem:[#allocation4 + $0x10] sm:$0xff] }
 0x239   : > { %v551_v36 = vpop.permute.xlu1 %550 }
 0x23a   : > { %v564_v37 = vmul.f32 %v551_v36, %v540_v35 }
 0x23c   : > { %v660_v39 = vadd.f32 %v610_v38, %v564_v37 }
 0x23e   : > { %664 = vst.msk [vmem:[#allocation4 + $0x8] sm:$0xff] %vm319_vm0, %v660_v39 }
 0x245   : > { %v683_v54 = vld [vmem:[#allocation4 + $0x8] sm:$0xff] }
 0x262   : > { %v529_v42 = vpop.xlane.xlu2 %528 }
 0x263   : > { %v533_v43 = vadd.f32 %v529_v42, %v517_v41 }
 0x265   : > { %538 = vst.msk [vmem:[#allocation3 + $0x18] sm:$0xff] %vm310_vm1, %v533_v43 }
 0x26a   : > { %v561_v45 = vpop.permute.xlu2 %560 }
 0x26b   : > { %v566_v46 = vmul.f32 %v561_v45, %v542_v44 }
 0x26c   : > { %v677_v48 = vld [vmem:[#allocation3 + $0x18] sm:$0xff] }
 0x26d   : > { %v662_v49 = vadd.f32 %v656_v47, %v566_v46  ;;  %1009 = vrcp.f32 %v677_v48 }
 0x26f   : > { %666 = vst.msk [vmem:[#allocation4 + $0x18] sm:$0xff] %vm319_vm0, %v662_v49 }
 0x273   : > { %v1010_v50 = vpop.eup %1009 }
 0x274   : > { %703 = vperm.xlu2 %986, %v1010_v50  }
 0x276   : > { %v685_v60 = vld [vmem:[#allocation4 + $0x18] sm:$0xff] }
 0x28b   : > { %v699_v51 = vpop.permute.xlu1 %698 }
 0x28c   : > { %v708_v53 = vmul.f32 %v699_v51, %v684_v52 }
 0x28d   : > { %v694_v55 = vpop.permute.xlu2 %693 }
 0x28e   : > { %712 = vst.msk [vmem:[%s301_s24 + $0x10] sm:$0xff] %vm319_vm0, %v708_v53  ;;  %v707_v56 = vmul.f32 %v694_v55, %v683_v54 }
 0x290   : > { %711 = vst.msk [vmem:[%s301_s24 + $0x8] sm:$0xff] %vm319_vm0, %v707_v56 }
 0x29d   : > { %v689_v58 = vpop.permute.xlu0 %688 }
 0x29e   : > { %v706_v59 = vmul.f32 %v689_v58, %v682_v57 }
 0x2a0   : > { %710 = vst.msk [vmem:[%s301_s24] sm:$0xff] %vm319_vm0, %v706_v59 }
 0x2ce   : > { %v704_v61 = vpop.permute.xlu2 %703 }
 0x2cf   : > { %v709_v62 = vmul.f32 %v704_v61, %v685_v60 }
 0x2d1   : > { %713 = vst.msk [vmem:[%s301_s24 + $0x18] sm:$0xff] %vm319_vm0, %v709_v62 }
 0x2d2   : > { %1128 = shalt.err (!%p1125_p13)
}
 0x2d3   : > { %s1194_s11 = smov 128   ;;  %s1195_s1 = smov 8  }
 0x2d4   : > { %911 = dma.vmem_to_hbm [thread:$0]  (%p1271_p9), %s729_s21, 512, %s731_s22, %s715_s23, %s1194_s11, %s1194_s11, %s1195_s1  }
 0x2d5 PF: > { %s1461_s20 = sld [smem:[#allocation17_spill]]  ;;  %s745_s28 = sand.u32 1, %s1167_s12  }
 0x2d6   : > { %p924_p0 = pnand %p869_p12, %p1278_p11  ;;  %s746_s16 = scalar_lea.sflag [#allocation7], %s745_s28 }
 0x2d8   : > { %p925_p1 = pneg %p924_p0 }
 0x2da   : > { %1162 = dma.done.wait (%p925_p1), %s746_s16, 512  }
 0x2db   : > { %1164 = vsyncadd (%p925_p1), %s746_s16, 4294966784  ;;  %s22_s17 = sadd.s32 1, %s1461_s20   ;;  %s1462_s14 = sld [smem:[#allocation15_spill]] }
 0x2dc   : > { %p19_p2 = scmp.ge.s32.totalorder %s22_s17, 4   ;;  %s1463_s26 = sld [smem:[#allocation19_spill]] }
 0x2dd   : > { %s1464_s15 = sld [smem:[#allocation16_spill]]  ;;  %s1466_s12 = smov %s1171_s13 }
 0x2de   : > { %s1465_s16 = sld [smem:[#allocation18_spill]]  ;;  %21 = sbr.rel (!%p19_p2) target bundleno = 10 (0xa), region = 109 }
 0x2e1   : > { %s1467_s13 = smov %s1462_s14 }
 0x2e2   : > { %s1468_s14 = smov %s1463_s26 }
 0x2e3   :  { %752 = vsyncpa [#allocation6], 1 }
 0x2e4   :  { %754 = vsyncpa [#allocation6 + $0x1], 1 }
 0x2e5   :  { %755 = vsyncpa [#allocation9], 1 }
 0x2e6   :  { %757 = vsyncpa [#allocation9 + $0x1], 1 }
 0x2e7   :  { %758 = vsyncpa [#allocation7], 1 }
 0x2e8   :  { %760 = vsyncpa [#allocation7 + $0x1], 1 }

</bundles_post_ra>
